<compile_context>
chip_gen: v5e
topology: v5e:2x2
jax: 0.10.0
libtpu: 0.0.40
codegen_flags: <defaults>
</compile_context>

<pallas_src>
import math

import jax
import jax.numpy as jnp
import numpy as np
from jax.experimental import pallas as pl
from jax.experimental.pallas import tpu as pltpu


def _round_up(a, b):
    return (a + b - 1) // b * b


def _pick_class_tile(n128, upper):
    """Largest multiple of 128 <= upper that divides n128 (n128 % 128 == 0)."""
    upper = max(128, min(upper, n128))
    upper = (upper // 128) * 128
    for cand in range(upper, 127, -128):
        if n128 % cand == 0:
            return cand
    return 128


def _ada_arc_kernel(x_ref, w_ref, meta_ref, out_ref):
    # x_ref:    [TB, D]  bf16  pre-normalized rows of x
    # w_ref:    [D,  TN] bf16  pre-normalized, transposed weight tile, ×s
    # meta_ref: [TB, 2]  f32   col0 = label (exact float), col1 = phi * s
    # out_ref:  [TB, TN] bf16  logits (already ×s)
    logits = jax.lax.dot_general(
        x_ref[...], w_ref[...],
        dimension_numbers=(((1,), (0,)), ((), ())),
        preferred_element_type=jnp.float32)                    # s * cosine, f32

    tb, tn = logits.shape
    # Tile-local target column: compare a lane iota against (label - j*TN).
    local_label = meta_ref[:, 0:1].astype(jnp.int32) - pl.program_id(0) * tn
    is_target = jax.lax.broadcasted_iota(jnp.int32, (tb, tn), 1) == local_label
    phi_s = meta_ref[:, 1:2]                                   # [TB, 1] f32

    out_ref[...] = jnp.where(is_target, phi_s, logits).astype(out_ref.dtype)


class AdaArcMarginProductPallas:
    """ArcFace head with adaptive per-class margin (sub == 1)."""
    # TODO(synk): sub > 1 branch (view + max over sub-centers) not implemented.

    def __init__(self, weight, M, *, s=32.0, m=0.5, easy_margin=False,
                 out_dtype=jnp.bfloat16):
        N, D = weight.shape
        self.N, self.D = int(N), int(D)
        self.s = float(s)
        self.easy_margin = bool(easy_margin)
        self.out_dtype = out_dtype

        eps = 1e-12
        wf = weight.astype(jnp.float32)
        inv_norm = 1.0 / jnp.maximum(
            jnp.sqrt(jnp.sum(wf * wf, axis=-1, keepdims=True)), eps)
        self.w_n = wf * inv_norm                               # [N, D] f32 (for per-row cos_t)

        # --- cached, one-shot weight prep for the kernel ------------------
        self.N128 = _round_up(self.N, 128)
        self.TN_default = _pick_class_tile(self.N128, 1024)
        wT_s = (self.w_n * self.s).T.astype(jnp.bfloat16)      # [D, N], normalized & ×s
        self.wT = jnp.pad(wT_s, ((0, 0), (0, self.N128 - self.N)))  # [D, N128] bf16

        # --- margin terms (mirrors module __init__ clamp + precompute) ----
        Mc = jnp.clip(M.astype(jnp.float32), m, jnp.pi)
        self.cos_m = jnp.cos(Mc)
        self.sin_m = jnp.sin(Mc)
        self.th = jnp.cos(jnp.pi - Mc)
        self.mm = jnp.sin(jnp.pi - Mc) * Mc

    def __call__(self, x, label):
        B, D = x.shape
        assert D == self.D
        eps = 1e-12

        # ---- per-call wrapper work (tiny, f32) ---------------------------
        xf = x.astype(jnp.float32)
        x_n = xf * jax.lax.rsqrt(
            jnp.maximum(jnp.sum(xf * xf, axis=-1, keepdims=True), eps * eps))

        lab = label.astype(jnp.int32)
        w_y = jnp.take(self.w_n, lab, axis=0)                  # [B, D]
        cos_t = jnp.sum(x_n * w_y, axis=-1, keepdims=True)     # [B, 1] f32 (target cosine)
        sin_t = jnp.sqrt(jnp.maximum(1.0 - cos_t * cos_t, 0.0))
        cm = self.cos_m[lab][:, None]
        sm = self.sin_m[lab][:, None]
        th = self.th[lab][:, None]
        mm = self.mm[lab][:, None]
        phi = cos_t * cm - sin_t * sm
        if self.easy_margin:
            phi = jnp.where(cos_t > 0.0, phi, cos_t)
        else:
            phi = jnp.where(cos_t - th > 0.0, phi, cos_t - mm)
        phi_s = phi * self.s                                    # [B, 1] f32

        # ---- tiling ------------------------------------------------------
        TB = min(256, _round_up(B, 16))                         # bf16 sublane packing
        B_pad = _round_up(B, TB)
        N_pad = self.N128
        TN = self.TN_default
        # v7x: keep >= 2 parallel blocks so both TensorCores get work.
        if (N_pad // TN) * (B_pad // TB) < 2 and N_pad >= 256:
            TN = _pick_class_tile(N_pad, N_pad // 2)

        x_bf = jnp.pad(x_n.astype(jnp.bfloat16), ((0, B_pad - B), (0, 0)))
        meta = jnp.concatenate(
            [lab.astype(jnp.float32)[:, None], phi_s], axis=1)  # [B, 2] f32
        meta = jnp.pad(meta, ((0, B_pad - B), (0, 0)))          # padded rows: label=0 (<N)

        grid = (N_pad // TN, B_pad // TB)                       # class outer, batch inner

        # Explicit VMEM budget; cap at 48 MiB (v7x has only 64 MiB / TC).
        vmem_bytes = 2 * (TB * D * 2 + D * TN * 2 + TB * 2 * 4 + TB * TN * 2) + (4 << 20)
        vmem_limit = int(min(max(vmem_bytes, 16 << 20), 48 << 20))

        out = pl.pallas_call(
            _ada_arc_kernel,
            out_shape=jax.ShapeDtypeStruct((B_pad, N_pad), self.out_dtype),
            grid_spec=pltpu.PrefetchScalarGridSpec(
                num_scalar_prefetch=0,
                grid=grid,
                in_specs=[
                    pl.BlockSpec((TB, D), lambda j, i: (i, 0)),   # x (streams on inner axis)
                    pl.BlockSpec((D, TN), lambda j, i: (0, j)),   # W^T tile (resident over i)
                    pl.BlockSpec((TB, 2), lambda j, i: (i, 0)),   # label + phi*s
                ],
                out_specs=pl.BlockSpec((TB, TN), lambda j, i: (i, j)),
            ),
            compiler_params=pltpu.CompilerParams(
                dimension_semantics=("parallel", "parallel"),
                vmem_limit_bytes=vmem_limit),
        )(x_bf, self.wT, meta)

        return out[:B, :self.N]


def _reference(x, label, weight, M, s=32.0, m=0.5, easy_margin=False):
    """Pure-JAX f32 reference mirroring the PyTorch forward (sub == 1)."""
    eps = 1e-12
    Mc = jnp.clip(M.astype(jnp.float32), m, jnp.pi)
    x_n = x / jnp.maximum(jnp.linalg.norm(x, axis=-1, keepdims=True), eps)
    w_n = weight / jnp.maximum(jnp.linalg.norm(weight, axis=-1, keepdims=True), eps)
    cosine = x_n @ w_n.T
    N = weight.shape[0]
    one_hot = jax.nn.one_hot(label, N, dtype=jnp.float32)
    cos_m = (one_hot @ jnp.cos(Mc))[:, None]
    sin_m = (one_hot @ jnp.sin(Mc))[:, None]
    th = (one_hot @ jnp.cos(jnp.pi - Mc))[:, None]
    mm = (one_hot @ (jnp.sin(jnp.pi - Mc) * Mc))[:, None]
    sine = jnp.sqrt(jnp.maximum(1.0 - cosine ** 2, 0.0))
    phi = cosine * cos_m - sine * sin_m
    if easy_margin:
        phi = jnp.where(cosine > 0, phi, cosine)
    else:
        phi = jnp.where(cosine - th > 0, phi, cosine - mm)
    out = one_hot * phi + (1.0 - one_hot) * cosine
    return out * s


if __name__ == "__main__":
    # Module defaults: in_features=128, out_features=200, s=32.0, m=0.5, sub=1.
    in_features = 128
    out_features = 200
    s_scale = 32.0
    m_margin = 0.5
    B = 8

    key = jax.random.PRNGKey(0)
    k_x, k_w, k_l = jax.random.split(key, 3)

    x = jax.random.normal(k_x, (B, in_features), dtype=jnp.float32)
    label = jax.random.randint(k_l, (B,), 0, out_features, dtype=jnp.int32)

    # Deterministic parameter init mirroring __init__:
    #   xavier_uniform_(weight): U(-a, a), a = sqrt(6/(fan_in+fan_out))
    bound = math.sqrt(6.0 / (in_features + out_features))
    weight = jax.random.uniform(k_w, (out_features, in_features),
                                minval=-bound, maxval=bound, dtype=jnp.float32)
    #   zeros_(M); clamped to [m, pi] inside the head (as in the PyTorch module).
    M = jnp.zeros((out_features,), jnp.float32)

    head = AdaArcMarginProductPallas(weight, M, s=s_scale, m=m_margin,
                                     easy_margin=False)
    out = head(x, label)
    out = jax.block_until_ready(out)

    ref = _reference(x, label, weight, M, s=s_scale, m=m_margin, easy_margin=False)
    # bf16 MXU inputs + bf16 logits (f32 accumulation, f32 target-column phi).
    np.testing.assert_allclose(np.asarray(out, dtype=np.float32), np.asarray(ref),
                               rtol=2e-2, atol=3e-1)

    print("KERNEL_OK")
</pallas_src>

<mosaic_0001>
module attributes {stable_mosaic.version = 11 : i64} {
  func.func @_ada_arc_kernel(%arg0: i32, %arg1: i32, %arg2: memref<16x128xbf16, #tpu.memory_space<vmem>>, %arg3: memref<128x128xbf16, #tpu.memory_space<vmem>>, %arg4: memref<16x2xf32, #tpu.memory_space<vmem>>, %arg5: memref<16x128xbf16, #tpu.memory_space<vmem>>) attributes {dimension_semantics = [#tpu.dimension_semantics<parallel>, #tpu.dimension_semantics<parallel>], iteration_bounds = array<i64: 2, 1>, scalar_prefetch = 0 : i64, scratch_operands = 0 : i64, tpu.core_type = #tpu.core_type<tc>, window_params = [{transform_indices = @transform_0, window_bounds = array<i64: 16, 128>}, {transform_indices = @transform_1, window_bounds = array<i64: 128, 128>}, {transform_indices = @transform_2, window_bounds = array<i64: 16, 2>}, {transform_indices = @transform_3, window_bounds = array<i64: 16, 128>}]} {
    %c0 = arith.constant 0 : index
    %c0_0 = arith.constant 0 : index
    %0 = vector.load %arg2[%c0, %c0_0] : memref<16x128xbf16, #tpu.memory_space<vmem>>, vector<16x128xbf16>
    %c0_1 = arith.constant 0 : index
    %c0_2 = arith.constant 0 : index
    %1 = vector.load %arg3[%c0_1, %c0_2] : memref<128x128xbf16, #tpu.memory_space<vmem>>, vector<128x128xbf16>
    %cst = arith.constant dense<0.000000e+00> : vector<16x128xf32>
    %2 = tpu.matmul %0, %1, %cst {dimension_numbers = #tpu.dot_dimension_numbers<[1], [0], [0], [1], [0, 0, 1, 1], [], []>} : vector<16x128xbf16>, vector<128x128xbf16>, vector<16x128xf32> -> vector<16x128xf32>
    %c0_3 = arith.constant 0 : index
    %c0_4 = arith.constant 0 : index
    %3 = vector.load %arg4[%c0_3, %c0_4] : memref<16x2xf32, #tpu.memory_space<vmem>>, vector<16x1xf32>
    %4 = arith.fptosi %3 : vector<16x1xf32> to vector<16x1xi32>
    %c128_i32 = arith.constant 128 : i32
    %5 = arith.muli %arg0, %c128_i32 : i32
    %6 = vector.broadcast %5 : i32 to vector<16x1xi32>
    %7 = arith.subi %4, %6 : vector<16x1xi32>
    %8 = tpu.iota {dimensions = array<i32: 1>} : vector<16x128xi32>
    %9 = vector.broadcast %7 : vector<16x1xi32> to vector<16x128xi32>
    %10 = arith.cmpi eq, %8, %9 : vector<16x128xi32>
    %c0_5 = arith.constant 0 : index
    %c1 = arith.constant 1 : index
    %11 = vector.load %arg4[%c0_5, %c1] : memref<16x2xf32, #tpu.memory_space<vmem>>, vector<16x1xf32>
    %12 = vector.shape_cast %11 : vector<16x1xf32> to vector<16x1xf32>
    %13 = vector.broadcast %12 : vector<16x1xf32> to vector<16x128xf32>
    %14 = arith.select %10, %13, %2 : vector<16x128xi1>, vector<16x128xf32>
    %15 = arith.truncf %14 : vector<16x128xf32> to vector<16x128xbf16>
    %c0_6 = arith.constant 0 : index
    %c0_7 = arith.constant 0 : index
    %16 = vector.load %arg5[%c0_6, %c0_7] : memref<16x128xbf16, #tpu.memory_space<vmem>>, vector<16x128xbf16>
    tpu.vector_store %arg5[%c0_6, %c0_7], %15 {strides = array<i32>} : memref<16x128xbf16, #tpu.memory_space<vmem>>, vector<16x128xbf16>,
    return
  }
  func.func @transform_0(%arg0: i32, %arg1: i32) -> (i32, i32) {
    %c0_i32 = arith.constant 0 : i32
    %c0_i32_0 = arith.constant 0 : i32
    return %arg1, %c0_i32 : i32, i32
  }
  func.func @transform_1(%arg0: i32, %arg1: i32) -> (i32, i32) {
    %c0_i32 = arith.constant 0 : i32
    %c0_i32_0 = arith.constant 0 : i32
    return %c0_i32, %arg0 : i32, i32
  }
  func.func @transform_2(%arg0: i32, %arg1: i32) -> (i32, i32) {
    %c0_i32 = arith.constant 0 : i32
    %c0_i32_0 = arith.constant 0 : i32
    return %arg1, %c0_i32 : i32, i32
  }
  func.func @transform_3(%arg0: i32, %arg1: i32) -> (i32, i32) {
    %c0_i32 = arith.constant 0 : i32
    return %arg1, %arg0 : i32, i32
  }
}

</mosaic_0001>

<bundles_post_ra>
// kernel: tpu_custom_call.1
= control target key start
LH: loop header
LB: loop body
LE: loop exit
PB: predicated region body
PF: predicated region fallthrough
CT: control target
= control target key end

     0   :  { %8 = vsyncpa [#allocation3], 0  ;;  %s937_s0 = inlined_call_operand.vmem [shape: bf16[16,128], index: 0, kind: input, shape index: {}]   ;;  %s938_s1 = inlined_call_operand.hbm [shape: bf16[128,256], index: 1, kind: input, shape index: {}]   ;;  %s939_s2 = inlined_call_operand.vmem [shape: f32[16,2], index: 2, kind: input, shape index: {}]   ;;  %s940_s3 = inlined_call_operand.hbm [shape: bf16[16,256], index: 3, kind: output, shape index: {}]  }
   0x1   :  { %10 = vsyncpa [#allocation3 + $0x1], 0 }
   0x2   :  { %11 = vsyncpa [#allocation4], 0 }
   0x3   :  { %13 = vsyncpa [#allocation4 + $0x1], 0  ;;  %s796_s12 = smov 0   ;;  %s798_s13 = smov 0  }
   0x4   :  { %s800_s14 = smov 0   ;;  %s802_s15 = smov 0  }
   0x5   :  { %s804_s16 = smov 0   ;;  %s806_s17 = smov 0  }
   0x6 LB: > { %s500_s18 = sadd.s32 4294967295, %s766_s17   ;;  %s501_s19 = sadd.s32 4294967294, %s766_s17   ;;  %s766_s17 = sphi %s806_s17, %s19_s17   ;;  %s762_s16 = sphi %s804_s16, %s949_s16   ;;  %s758_s15 = sphi %s802_s15, %s948_s15   ;;  %s754_s14 = sphi %s800_s14, %s947_s14   ;;  %s750_s13 = sphi %s798_s13, %s946_s13   ;;  %s746_s12 = sphi %s796_s12, %s945_s12  }
   0x7   : > { %s31_s20 = sadd.s32 1, %s762_s16  ;;  %s64_s21 = sadd.s32 1, %s754_s14 }
   0x8   : > { %p33_p0 = scmp.ge.s32.totalorder %s31_s20, 2  ;;  %p71_p1 = scmp.ne.s32.totalorder %s754_s14, %s750_s13 }
   0x9   : > { %p72_p2 = scmp.eq.s32.totalorder %s766_s17, 0  ;;  %p77_p3 = scmp.ne.s32.totalorder %s750_s13, %s746_s12 }
   0xa   : > { %s951_s20 = smov (%p33_p0, %s31_s20), 0  ;;  %p78_p5 = scmp.eq.s32.totalorder %s500_s18, 0 }
   0xb   : > { %p837_p4 = por %p72_p2, %p71_p1  ;;  %s61_s23 = ssub.s32 %s762_s16, %s951_s20 }
   0xc   : > { %p129_p6 = scmp.eq.s32.totalorder %s500_s18, 1  ;;  %p62_p7 = scmp.eq.s32.totalorder %s61_s23, 0 }
   0xd   : > { %p843_p8 = por %p78_p5, %p77_p3  ;;  %p135_p10 = scmp.eq.s32.totalorder %s501_s19, 1 }
   0xe   : > { %p847_p9 = por %p129_p6, %p71_p1  ;;  %p505_p12 = scmp.ge.s32.totalorder %s766_s17, 2 }
   0xf   : > { %s852_s26 = scalar_select %p62_p7, %s754_s14, %s64_s21  }
  0x10   : > { %p854_p11 = por %p135_p10, %p77_p3  ;;  %p588_p13 = scmp.lt.s32.totalorder %s766_s17, 2 }
  0x11   : > { %s173_s28 = sand.u32 1, %s754_s14   ;;  %s507_s30 = sshll.u32 %s762_s16, 2 }
  0x12   : > { %s506_s29 = sshll.u32 %s173_s28, 6  ;;  %s181_s6 = scalar_lea.hbm %s938_s1, %s507_s30 }
  0x13   : > { %s177_s7 = scalar_lea.vmem [#allocation2], %s506_s29  ;;  %s182_s9 = sshll.u32 %s181_s6, 4  ;;  %s183_s9 = int_to_ptr.hbm [resolvable:$true] %s182_s9 }
  0x14   : > { %s184_s8 = sshll.u32 %s177_s7, 4  ;;  %p581_p0 = pnand %p588_p13, %p837_p4  ;;  %s185_s8 = int_to_ptr.vmem [resolvable:$true] %s184_s8 }
  0x15   : > { %s174_s10 = scalar_lea.sflag [#allocation3], %s173_s28  ;;  %s768_s11 = smov 128  }
  0x16   : > { %s769_s18 = smov 64   ;;  %s770_s19 = smov 4  }
  0x17   : > { %583 = dma.hbm_to_vmem [thread:$0]  (!%p581_p0), %s183_s9, 1024, %s185_s8, %s174_s10, %s768_s11, %s769_s18, %s770_s19  }
  0x18   : > { %p508_p1 = scmp.ge.s32.totalorder %s766_s17, 1  ;;  %p192_p2 = scmp.lt.s32.totalorder %s766_s17, 3 }
  0x1a   : > { %p193_p3 = pnand %p508_p1, %p192_p2 }
  0x1b   : > { %s870_s21 = sand.u32 (!%p193_p3), 1, %s750_s13  }
  0x1c   : > { %196 = sbr.rel (%p193_p3) target bundleno = 208 (0xd0), region = 32  ;;  %s509_s23 = sshll.u32 (!%p193_p3), %s870_s21, 6 }
  0x1d   : > { %s199_s29 = scalar_lea.sflag (!%p193_p3), [#allocation3], %s870_s21  ;;  %s874_s30 = scalar_lea.vmem (!%p193_p3), [#allocation2], %s509_s23 }
  0x21   : > { %737 = dma.done.wait (%p843_p8), %s199_s29, 1024  }
  0x22   : > { %739 = vsyncadd (%p843_p8), %s199_s29, 4294966272  ;;  %v560_v0 = vld [vmem:[%s874_s30 + $0x38] sm:$0xff]  ;;  %v559_v1 = vld [vmem:[%s874_s30 + $0x30] sm:$0xff]  ;;  %v771_v2 = vmov 0   ;;  %s547_s6 = sshll.u32 %s758_s15, 7  ;;  %v772_v5 = vmov 1   ;;  %v343_v26 = vlaneseq }
  0x23   : > { %321 = vmatpush.bf16.msra.mxu0 %v560_v0  ;;  %646 = vset.pattern.permute.xlu0 %v771_v2  ;;  %v335_v3 = vld [vmem:[%s939_s2] sm:$0xff]  ;;  %v336_v4 = vld [vmem:[%s939_s2 + $0x8] sm:$0xff]  ;;  %v340_v13 = vstv %s547_s6  ;;  %v556_v19 = vld [vmem:[%s874_s30 + $0x18] sm:$0xff]  ;;  %s510_s8 = sshll.u32 %s870_s21, 3  ;;  %s549_s9 = sshll.u32 %s758_s15, 2 }
  0x24   : > { %647 = vset.pattern.permute.xlu1 %v772_v5  ;;  %vm566_vm0 = vcmp.lt.s32.totalorder %v335_v3, 0  ;;  %v567_v6 = vceil.f32 %v335_v3  ;;  %v568_v7 = vfloor.f32 %v335_v3  ;;  %vm571_vm1 = vcmp.lt.s32.totalorder %v336_v4, 0  ;;  %v558_v11 = vld [vmem:[%s874_s30 + $0x28] sm:$0xff]  ;;  %v557_v17 = vld [vmem:[%s874_s30 + $0x20] sm:$0xff]  ;;  %v555_v21 = vld [vmem:[%s874_s30 + $0x10] sm:$0xff]  ;;  %s383_s18 = scalar_lea.hbm %s940_s3, %s549_s9  ;;  %s235_s19 = scalar_lea.vmem [#allocation5], %s510_s8 }
  0x25   : > { %v572_v8 = vceil.f32 %v336_v4  ;;  %v573_v9 = vfloor.f32 %v336_v4  ;;  %v648_v10 = vpack.i.bf16 %v336_v4, %v335_v3  ;;  %v554_v22 = vld [vmem:[%s874_s30 + $0x8] sm:$0xff]  ;;  %v553_v23 = vld [vmem:[%s874_s30] sm:$0xff]  ;;  %v344_v28 = vand.u32 127, %v343_v26  ;;  %s384_s23 = sshll.u32 %s235_s19, 4  ;;  %s386_s29 = sshll.u32 %s383_s18, 4  ;;  %s385_s23 = int_to_ptr.vmem [resolvable:$true] %s384_s23  ;;  %s387_s29 = int_to_ptr.hbm [resolvable:$true] %s386_s29 }
  0x26   : > { %v569_v12 = vsel %vm566_vm0, %v567_v6, %v568_v7  ;;  %v552_v24 = vld [vmem:[%s937_s0] sm:$0xff]  ;;  %s370_s15 = scalar_lea.sflag [#allocation4], %s870_s21  ;;  %s698_s30 = sshra.s32 %s387_s29, 4  ;;  %s699_s30 = int_to_ptr.hbm [resolvable:$true] %s698_s30 }
  0x27   : > { %322 = vmatpush.bf16.msra.mxu0 %v559_v1  ;;  %v570_v14 = vcvt.f32.s32 %v569_v12  ;;  %649 = vperm.xlu1 %647, %v648_v10   ;;  %v574_v15 = vsel %vm571_vm1, %v572_v8, %v573_v9  ;;  %s700_s22 = scalar_lea.hbm %s699_s30, 8  ;;  %s704_s5 = scalar_lea.hbm %s940_s3, 16 }
  0x28   : > { %v575_v18 = vcvt.f32.s32 %v574_v15  ;;  %p701_p4 = scmp.ne.s32.totalorder %s699_s30, %s700_s22  ;;  %p705_p7 = scmp.lt.s32.totalorder %s699_s30, %s940_s3 }
  0x29   : > { %v341_v16 = vsub.s32 %v570_v14, %v340_v13  ;;  %p706_p8 = scmp.lt.s32.totalorder %s704_s5, %s700_s22 }
  0x2a   : > { %v342_v20 = vsub.s32 %v575_v18, %v340_v13  ;;  %p702_p5 = pnand %p701_p4, %p847_p9 }
  0x2b   : > { %323 = vmatpush.bf16.msra.mxu0 %v558_v11  ;;  %346 = vperm.xlu0 %646, %v341_v16   ;;  %p707_p10 = por %p706_p8, %p705_p7 }
  0x2c   : > { %p703_p6 = pneg %p702_p5 }
  0x2e   : > { %p708_p13 = pnand %p707_p10, %p703_p6 }
  0x2f   : > { %324 = vmatpush.bf16.msra.mxu0 %v557_v17 }
  0x33   : > { %325 = vmatpush.bf16.msra.mxu0 %v556_v19  ;;  %349 = vperm.xlu0 %646, %v342_v20  }
  0x37   : > { %326 = vmatpush.bf16.msra.mxu0 %v555_v21 }
  0x3b   : > { %327 = vmatpush.bf16.msra.mxu0 %v554_v22  ;;  %653 = vset.pattern.permute.xlu0 %v772_v5 }
  0x3f   : > { %328 = vmatpush.bf16.msra.mxu0 %v553_v23 }
  0x42   : > { %329 = vmatmul.bf16.vlgmr.msra.gmra.mxu0 %v552_v24 }
  0x99   : > { %v650_v29 = vpop.permute.xlu1 %649 }
  0x9a   : > { %v652_v30 = vunpack.i.h.bf16 %v650_v29  ;;  %v651_v31 = vunpack.i.l.bf16 %v650_v29 }
  0x9d   : > { %v347_v25 = vpop.permute.xlu0 %346 }
  0x9e   : > { %vm351_vm2 = vcmp.eq.s32.totalorder %v344_v28, %v347_v25 }
  0xa5   : > { %v350_v32 = vpop.permute.xlu0 %349 }
  0xa6   : > { %vm352_vm3 = vcmp.eq.s32.totalorder %v344_v28, %v350_v32 }
  0xbf   : > { %v330_v27 = vpop.f32.mrf.mxu0 }
  0xc0   : > { %v363_v34 = vsel %vm351_vm2, %v651_v31, %v330_v27 }
  0xc7   : > { %v332_v33 = vpop.f32.mrf.mxu0 }
  0xc8   : > { %v364_v35 = vsel %vm352_vm3, %v652_v30, %v332_v33 }
  0xc9   : > { %v564_v36 = vpack.c.bf16 %v364_v35, %v363_v34 }
  0xcb   : > { %565 = vst [vmem:[%s235_s19] sm:$0xff] %v564_v36  }
  0xcc   : > { %711 = shalt.err (!%p708_p13)
}
  0xcd   : > { %s773_s21 = smov 64   ;;  %s774_s7 = smov 128  }
  0xce   : > { %s775_s8 = smov 4  }
  0xcf   : > { %578 = dma.vmem_to_hbm [thread:$0]  (%p847_p9), %s385_s23, 128, %s387_s29, %s370_s15, %s773_s21, %s774_s7, %s775_s8  }
  0xd0 PF: > { %s401_s9 = sand.u32 1, %s746_s12   ;;  %p585_p0 = pnand %p505_p12, %p854_p11 }
  0xd1   : > { %s402_s10 = scalar_lea.sflag [#allocation4], %s401_s9 }
  0xd2   : > { %p586_p1 = pneg %p585_p0 }
  0xd4   : > { %741 = dma.done.wait (%p586_p1), %s402_s10, 128  }
  0xd5   : > { %743 = vsyncadd (%p586_p1), %s402_s10, 4294967168  ;;  %s19_s17 = sadd.s32 1, %s766_s17   ;;  %s945_s12 = smov %s750_s13 }
  0xd6   : > { %p16_p2 = scmp.ge.s32.totalorder %s19_s17, 4   ;;  %s946_s13 = smov %s754_s14 }
  0xd7   : > { %s947_s14 = smov %s852_s26  ;;  %s948_s15 = smov %s762_s16 }
  0xd8   : > { %s949_s16 = smov %s951_s20  ;;  %18 = sbr.rel (!%p16_p2) target bundleno = 6 (0x6), region = 83 }
  0xdd   :  { %408 = vsyncpa [#allocation3], 1 }
  0xde   :  { %410 = vsyncpa [#allocation3 + $0x1], 1 }
  0xdf   :  { %411 = vsyncpa [#allocation4], 1 }
  0xe0   :  { %413 = vsyncpa [#allocation4 + $0x1], 1 }

</bundles_post_ra>
